<compile_context>
chip_gen: v7x
topology: tpu7x:2x2x1
jax: 0.10.0
libtpu: 0.0.40
codegen_flags: <defaults>
</compile_context>

<pallas_src>
import functools

import jax
import jax.numpy as jnp
from jax.experimental import pallas as pl
from jax.experimental.pallas import tpu as pltpu


def _round_up(a: int, b: int) -> int:
    return ((a + b - 1) // b) * b


def _res_block_kernel(x_ref, vec_ref, w1_ref, w2_ref, o_ref, *,
                      eps: float, c_real: int, pad_cols: int,
                      approximate_gelu: bool):
    # ---- LayerNorm over the real channel dim (padded lanes hold zeros) ----
    x = x_ref[...].astype(jnp.float32)                     # (TM, Cp)
    vecs = vec_ref[...].astype(jnp.float32)                # (4, Cp): gamma, beta, b1, b2
    gamma, beta, b1, b2 = vecs[0:1], vecs[1:2], vecs[2:3], vecs[3:4]

    inv_c = jnp.float32(1.0 / c_real)
    mean = jnp.sum(x, axis=-1, keepdims=True) * inv_c      # pad lanes contribute 0
    xc = x - mean
    ssq = jnp.sum(xc * xc, axis=-1, keepdims=True)         # two-pass variance
    if pad_cols:
        # each zero-padded lane contributed exactly mean^2 to ssq; remove it.
        ssq = ssq - jnp.float32(pad_cols) * (mean * mean)
    var = jnp.maximum(ssq * inv_c, 0.0)
    xn = xc * jax.lax.rsqrt(var + jnp.float32(eps)) * gamma + beta
    # Padded lanes: gamma = beta = 0 there, so xn is exactly 0 in those lanes.

    # ---- proj: Linear -> GELU -> Linear; MXU fed in the weight dtype, f32 acc ----
    w1 = w1_ref[...]
    xn_mm = xn.astype(w1.dtype)     # single live copy in matmul dtype (cuts f32 pressure)
    h = jnp.dot(xn_mm, w1, preferred_element_type=jnp.float32) + b1
    if approximate_gelu:
        # tanh GELU -> EUP slot; keeps the v5e VPU from saturating on the erf polynomial.
        h = 0.5 * h * (1.0 + jnp.tanh(0.7978845608028654 * (h + 0.044715 * h * h * h)))
    else:
        # exact erf GELU (matches nn.GELU() default)
        h = 0.5 * h * (1.0 + jax.lax.erf(h * jnp.float32(0.7071067811865476)))

    w2 = w2_ref[...]
    y = jnp.dot(h.astype(w2.dtype), w2, preferred_element_type=jnp.float32) + b2

    # ---- residual: xn + proj(xn) ----
    o_ref[...] = (xn_mm.astype(jnp.float32) + y).astype(o_ref.dtype)


def simple_res_block(x, gamma, beta, w1, b1, w2, b2, *, eps=1e-5,
                     tile_m=None, matmul_dtype=None, approximate_gelu=False):
    """x: (B, S, C).  w1/w2 are stored (in, out) (nn.Linear weight transposed).

    Channels are zero-padded to a multiple of 128 (lane-dense output, full MXU K/N),
    tokens to the row tile.  For production, pass bf16 weights or
    matmul_dtype=jnp.bfloat16: f32 matmuls cost multiple bf16 MXU passes and double
    the resident-weight VMEM footprint (the binding constraint on v7x).
    """
    B, S, C = x.shape
    N = B * S

    if matmul_dtype is not None:
        w1 = w1.astype(matmul_dtype)
        w2 = w2.astype(matmul_dtype)
    w_itemsize = jnp.dtype(w1.dtype).itemsize
    x_itemsize = jnp.dtype(x.dtype).itemsize
    sublane = 16 if x.dtype == jnp.bfloat16 else 8

    # Lane-dense channel dim.
    Cp = _round_up(max(C, 128), 128)
    pad_c = Cp - C

    # --- VMEM-capacity-driven row tile -------------------------------------
    try:
        vmem_cap = int(pltpu.get_tpu_info().vmem_capacity_bytes)
    except Exception:
        vmem_cap = 64 * 1024 * 1024          # conservative: v7x per-TC VMEM
    budget = int(0.75 * vmem_cap)
    # Resident operands (single-buffered constant specs): two (Cp,Cp) weights + vecs.
    resident = 2 * Cp * Cp * w_itemsize + 2 * 4 * Cp * 4
    # Per tile row: double-buffered x/out blocks plus ~4 f32-wide temporaries.
    per_row = Cp * (2 * 2 * x_itemsize + 4 * 4)
    tm_cap = max(sublane, (budget - resident) // per_row)

    n_rows = _round_up(N, sublane)
    tm = min(512 if tile_m is None else int(tile_m), n_rows)
    if n_rows >= 2 * sublane:
        # keep >= 2 grid steps so the v7x megacore "parallel" axis can split.
        tm = min(tm, _round_up(-(-N // 2), sublane))
    tm = min(tm, tm_cap)
    tm = max(sublane, (tm // sublane) * sublane)
    if tm >= 256:
        tm = (tm // 128) * 128               # MXU-M friendly for large tiles

    Np = _round_up(N, tm)

    # --- pad operands --------------------------------------------------------
    x2 = jnp.pad(x.reshape(N, C), ((0, Np - N), (0, pad_c)))
    vecs = jnp.stack([
        jnp.pad(gamma.astype(jnp.float32), (0, pad_c)),
        jnp.pad(beta.astype(jnp.float32), (0, pad_c)),
        jnp.pad(b1.astype(jnp.float32), (0, pad_c)),
        jnp.pad(b2.astype(jnp.float32), (0, pad_c)),
    ])
    w1p = jnp.pad(w1, ((0, pad_c), (0, pad_c)))
    w2p = jnp.pad(w2, ((0, pad_c), (0, pad_c)))

    working = resident + tm * per_row
    vmem_limit = min(budget, max(32 * 1024 * 1024, int(1.25 * working)))

    cost = pl.CostEstimate(
        flops=4 * Np * Cp * Cp,                              # two (Np,Cp)x(Cp,Cp) matmuls
        transcendentals=Np * Cp,                             # GELU
        bytes_accessed=2 * Np * Cp * x_itemsize + 2 * Cp * Cp * w_itemsize + 4 * Cp * 4,
    )

    kernel = functools.partial(
        _res_block_kernel, eps=eps, c_real=C, pad_cols=pad_c,
        approximate_gelu=approximate_gelu)

    def build(const_buffers):
        kw = {"pipeline_mode": pl.Buffered(const_buffers)} if const_buffers else {}
        row_spec = pl.BlockSpec((tm, Cp), lambda i: (i, 0))
        vec_spec = pl.BlockSpec((4, Cp), lambda i: (0, 0), **kw)
        mat_spec = pl.BlockSpec((Cp, Cp), lambda i: (0, 0), **kw)
        return pl.pallas_call(
            kernel,
            out_shape=jax.ShapeDtypeStruct((Np, Cp), x.dtype),
            grid_spec=pltpu.PrefetchScalarGridSpec(
                num_scalar_prefetch=0,
                grid=(Np // tm,),
                in_specs=[row_spec, vec_spec, mat_spec, mat_spec],
                out_specs=row_spec,
            ),
            compiler_params=pltpu.CompilerParams(
                dimension_semantics=("parallel",),
                vmem_limit_bytes=vmem_limit,
            ),
            cost_estimate=cost,
        )

    try:
        # Single-buffer the constant-index weights/vectors: halves their VMEM.
        out = build(1)(x2, vecs, w1p, w2p)
    except Exception:
        # Fallback for JAX/Mosaic versions that reject single-buffered block specs.
        out = build(0)(x2, vecs, w1p, w2p)

    return out[:N, :C].reshape(B, S, C)


def _reference(x, gamma, beta, w1, b1, w2, b2, eps=1e-5):
    xf = x.astype(jnp.float32)
    mean = jnp.mean(xf, axis=-1, keepdims=True)
    var = jnp.mean((xf - mean) ** 2, axis=-1, keepdims=True)
    xn = (xf - mean) * jax.lax.rsqrt(var + eps) * gamma + beta
    h = xn @ w1 + b1
    h = 0.5 * h * (1.0 + jax.lax.erf(h / jnp.sqrt(2.0)))
    y = h @ w2 + b2
    return (xn + y).astype(x.dtype)


if __name__ == "__main__":
    # Shapes implied by the module: x is (batch, seq, channels).
    B, S, C = 2, 8, 32
    key = jax.random.PRNGKey(0)
    k_x, k_g, k_b, k_w1, k_b1, k_w2, k_b2 = jax.random.split(key, 7)

    x = jax.random.normal(k_x, (B, S, C), dtype=jnp.float32)
    gamma = jax.random.normal(k_g, (C,), dtype=jnp.float32) * 0.1 + 1.0
    beta = jax.random.normal(k_b, (C,), dtype=jnp.float32) * 0.1
    # nn.Linear weight is (out, in); stored transposed (in, out) so the kernel
    # computes xn @ W directly.
    w1 = jax.random.normal(k_w1, (C, C), dtype=jnp.float32) * (1.0 / jnp.sqrt(C))
    b1 = jax.random.normal(k_b1, (C,), dtype=jnp.float32) * 0.01
    w2 = jax.random.normal(k_w2, (C, C), dtype=jnp.float32) * (1.0 / jnp.sqrt(C))
    b2 = jax.random.normal(k_b2, (C,), dtype=jnp.float32) * 0.01

    out = jax.block_until_ready(simple_res_block(x, gamma, beta, w1, b1, w2, b2))
    ref = _reference(x, gamma, beta, w1, b1, w2, b2)
    assert out.shape == (B, S, C), out.shape
    assert jnp.allclose(out, ref, atol=1e-4, rtol=1e-4), \
        float(jnp.max(jnp.abs(out - ref)))

    # Ragged token count (exercises internal row padding + channel padding).
    B2, S2 = 3, 11
    x_b = jax.random.normal(k_x, (B2, S2, C), dtype=jnp.float32)
    out_b = jax.block_until_ready(simple_res_block(x_b, gamma, beta, w1, b1, w2, b2))
    ref_b = _reference(x_b, gamma, beta, w1, b1, w2, b2)
    assert jnp.allclose(out_b, ref_b, atol=1e-4, rtol=1e-4), \
        float(jnp.max(jnp.abs(out_b - ref_b)))

    print("KERNEL_OK")
</pallas_src>

<mosaic_0001>
module attributes {stable_mosaic.version = 11 : i64} {
  func.func @_res_block_kernel(%arg0: i32, %arg1: memref<8x128xf32, #tpu.memory_space<vmem>>, %arg2: memref<4x128xf32, #tpu.memory_space<vmem>>, %arg3: memref<128x128xf32, #tpu.memory_space<vmem>>, %arg4: memref<128x128xf32, #tpu.memory_space<vmem>>, %arg5: memref<8x128xf32, #tpu.memory_space<vmem>>) attributes {dimension_semantics = [#tpu.dimension_semantics<parallel>], iteration_bounds = array<i64: 2>, scalar_prefetch = 0 : i64, scratch_operands = 0 : i64, tpu.core_type = #tpu.core_type<tc>, window_params = [{transform_indices = @transform_0, window_bounds = array<i64: 8, 128>}, {pipeline_mode = #tpu.pipeline_mode<synchronous>, transform_indices = @transform_1, window_bounds = array<i64: 4, 128>}, {pipeline_mode = #tpu.pipeline_mode<synchronous>, transform_indices = @transform_2, window_bounds = array<i64: 128, 128>}, {pipeline_mode = #tpu.pipeline_mode<synchronous>, transform_indices = @transform_3, window_bounds = array<i64: 128, 128>}, {transform_indices = @transform_4, window_bounds = array<i64: 8, 128>}]} {
    %c0 = arith.constant 0 : index
    %c0_0 = arith.constant 0 : index
    %0 = vector.load %arg1[%c0, %c0_0] : memref<8x128xf32, #tpu.memory_space<vmem>>, vector<8x128xf32>
    %c0_1 = arith.constant 0 : index
    %c0_2 = arith.constant 0 : index
    %1 = vector.load %arg2[%c0_1, %c0_2] : memref<4x128xf32, #tpu.memory_space<vmem>>, vector<4x128xf32>
    %2 = vector.extract_strided_slice %1 {offsets = [0, 0], sizes = [1, 128], strides = [1, 1]} : vector<4x128xf32> to vector<1x128xf32>
    %3 = vector.extract_strided_slice %1 {offsets = [1, 0], sizes = [1, 128], strides = [1, 1]} : vector<4x128xf32> to vector<1x128xf32>
    %4 = vector.extract_strided_slice %1 {offsets = [2, 0], sizes = [1, 128], strides = [1, 1]} : vector<4x128xf32> to vector<1x128xf32>
    %5 = vector.extract_strided_slice %1 {offsets = [3, 0], sizes = [1, 128], strides = [1, 1]} : vector<4x128xf32> to vector<1x128xf32>
    %cst = arith.constant dense<0.000000e+00> : vector<8xf32>
    %6 = vector.multi_reduction <add>, %0, %cst [1] : vector<8x128xf32> to vector<8xf32>
    %7 = vector.shape_cast %6 : vector<8xf32> to vector<8x1xf32>
    %cst_3 = arith.constant 3.125000e-02 : f32
    %8 = vector.broadcast %cst_3 : f32 to vector<8x1xf32>
    %9 = arith.mulf %7, %8 : vector<8x1xf32>
    %10 = vector.broadcast %9 : vector<8x1xf32> to vector<8x128xf32>
    %11 = arith.subf %0, %10 : vector<8x128xf32>
    %12 = arith.mulf %11, %11 : vector<8x128xf32>
    %cst_4 = arith.constant dense<0.000000e+00> : vector<8xf32>
    %13 = vector.multi_reduction <add>, %12, %cst_4 [1] : vector<8x128xf32> to vector<8xf32>
    %14 = vector.shape_cast %13 : vector<8xf32> to vector<8x1xf32>
    %15 = arith.mulf %9, %9 : vector<8x1xf32>
    %cst_5 = arith.constant 9.600000e+01 : f32
    %16 = vector.broadcast %cst_5 : f32 to vector<8x1xf32>
    %17 = arith.mulf %16, %15 : vector<8x1xf32>
    %18 = arith.subf %14, %17 : vector<8x1xf32>
    %cst_6 = arith.constant 3.125000e-02 : f32
    %19 = vector.broadcast %cst_6 : f32 to vector<8x1xf32>
    %20 = arith.mulf %18, %19 : vector<8x1xf32>
    %cst_7 = arith.constant 0.000000e+00 : f32
    %21 = vector.broadcast %cst_7 : f32 to vector<8x1xf32>
    %22 = arith.maximumf %20, %21 : vector<8x1xf32>
    %cst_8 = arith.constant 9.99999974E-6 : f32
    %23 = vector.broadcast %cst_8 : f32 to vector<8x1xf32>
    %24 = arith.addf %22, %23 : vector<8x1xf32>
    %25 = math.rsqrt %24 : vector<8x1xf32>
    %26 = vector.broadcast %25 : vector<8x1xf32> to vector<8x128xf32>
    %27 = arith.mulf %11, %26 : vector<8x128xf32>
    %28 = vector.broadcast %2 : vector<1x128xf32> to vector<8x128xf32>
    %29 = arith.mulf %27, %28 : vector<8x128xf32>
    %30 = vector.broadcast %3 : vector<1x128xf32> to vector<8x128xf32>
    %31 = arith.addf %29, %30 : vector<8x128xf32>
    %c0_9 = arith.constant 0 : index
    %c0_10 = arith.constant 0 : index
    %32 = vector.load %arg3[%c0_9, %c0_10] : memref<128x128xf32, #tpu.memory_space<vmem>>, vector<128x128xf32>
    %cst_11 = arith.constant dense<0.000000e+00> : vector<8x128xf32>
    %33 = tpu.matmul %31, %32, %cst_11 {dimension_numbers = #tpu.dot_dimension_numbers<[1], [0], [0], [1], [0, 0, 1, 1], [], []>} : vector<8x128xf32>, vector<128x128xf32>, vector<8x128xf32> -> vector<8x128xf32>
    %34 = vector.broadcast %4 : vector<1x128xf32> to vector<8x128xf32>
    %35 = arith.addf %33, %34 : vector<8x128xf32>
    %cst_12 = arith.constant 5.000000e-01 : f32
    %36 = vector.broadcast %cst_12 : f32 to vector<8x128xf32>
    %37 = arith.mulf %36, %35 : vector<8x128xf32>
    %cst_13 = arith.constant 0.707106769 : f32
    %38 = vector.broadcast %cst_13 : f32 to vector<8x128xf32>
    %39 = arith.mulf %35, %38 : vector<8x128xf32>
    %40 = math.erf %39 : vector<8x128xf32>
    %cst_14 = arith.constant 1.000000e+00 : f32
    %41 = vector.broadcast %cst_14 : f32 to vector<8x128xf32>
    %42 = arith.addf %41, %40 : vector<8x128xf32>
    %43 = arith.mulf %37, %42 : vector<8x128xf32>
    %c0_15 = arith.constant 0 : index
    %c0_16 = arith.constant 0 : index
    %44 = vector.load %arg4[%c0_15, %c0_16] : memref<128x128xf32, #tpu.memory_space<vmem>>, vector<128x128xf32>
    %cst_17 = arith.constant dense<0.000000e+00> : vector<8x128xf32>
    %45 = tpu.matmul %43, %44, %cst_17 {dimension_numbers = #tpu.dot_dimension_numbers<[1], [0], [0], [1], [0, 0, 1, 1], [], []>} : vector<8x128xf32>, vector<128x128xf32>, vector<8x128xf32> -> vector<8x128xf32>
    %46 = vector.broadcast %5 : vector<1x128xf32> to vector<8x128xf32>
    %47 = arith.addf %45, %46 : vector<8x128xf32>
    %48 = arith.addf %31, %47 : vector<8x128xf32>
    %c0_18 = arith.constant 0 : index
    %c0_19 = arith.constant 0 : index
    %49 = vector.load %arg5[%c0_18, %c0_19] : memref<8x128xf32, #tpu.memory_space<vmem>>, vector<8x128xf32>
    tpu.vector_store %arg5[%c0_18, %c0_19], %48 {strides = array<i32>} : memref<8x128xf32, #tpu.memory_space<vmem>>, vector<8x128xf32>,
    return
  }
  func.func @transform_0(%arg0: i32) -> (i32, i32) {
    %c0_i32 = arith.constant 0 : i32
    %c0_i32_0 = arith.constant 0 : i32
    return %arg0, %c0_i32 : i32, i32
  }
  func.func @transform_1(%arg0: i32) -> (i32, i32) {
    %c0_i32 = arith.constant 0 : i32
    %c0_i32_0 = arith.constant 0 : i32
    %c0_i32_1 = arith.constant 0 : i32
    return %c0_i32, %c0_i32_0 : i32, i32
  }
  func.func @transform_2(%arg0: i32) -> (i32, i32) {
    %c0_i32 = arith.constant 0 : i32
    %c0_i32_0 = arith.constant 0 : i32
    %c0_i32_1 = arith.constant 0 : i32
    return %c0_i32, %c0_i32_0 : i32, i32
  }
  func.func @transform_3(%arg0: i32) -> (i32, i32) {
    %c0_i32 = arith.constant 0 : i32
    %c0_i32_0 = arith.constant 0 : i32
    %c0_i32_1 = arith.constant 0 : i32
    return %c0_i32, %c0_i32_0 : i32, i32
  }
  func.func @transform_4(%arg0: i32) -> (i32, i32) {
    %c0_i32 = arith.constant 0 : i32
    %c0_i32_0 = arith.constant 0 : i32
    return %arg0, %c0_i32 : i32, i32
  }
}

module attributes {stable_mosaic.version = 11 : i64} {
  func.func @_res_block_kernel(%arg0: i32, %arg1: memref<8x128xf32, #tpu.memory_space<vmem>>, %arg2: memref<4x128xf32, #tpu.memory_space<vmem>>, %arg3: memref<128x128xf32, #tpu.memory_space<vmem>>, %arg4: memref<128x128xf32, #tpu.memory_space<vmem>>, %arg5: memref<8x128xf32, #tpu.memory_space<vmem>>) attributes {dimension_semantics = [#tpu.dimension_semantics<parallel>], iteration_bounds = array<i64: 2>, scalar_prefetch = 0 : i64, scratch_operands = 0 : i64, tpu.core_type = #tpu.core_type<tc>, window_params = [{transform_indices = @transform_0, window_bounds = array<i64: 8, 128>}, {pipeline_mode = #tpu.pipeline_mode<synchronous>, transform_indices = @transform_1, window_bounds = array<i64: 4, 128>}, {pipeline_mode = #tpu.pipeline_mode<synchronous>, transform_indices = @transform_2, window_bounds = array<i64: 128, 128>}, {pipeline_mode = #tpu.pipeline_mode<synchronous>, transform_indices = @transform_3, window_bounds = array<i64: 128, 128>}, {transform_indices = @transform_4, window_bounds = array<i64: 8, 128>}]} {
    %c0 = arith.constant 0 : index
    %c0_0 = arith.constant 0 : index
    %0 = vector.load %arg1[%c0, %c0_0] : memref<8x128xf32, #tpu.memory_space<vmem>>, vector<8x128xf32>
    %c0_1 = arith.constant 0 : index
    %c0_2 = arith.constant 0 : index
    %1 = vector.load %arg2[%c0_1, %c0_2] : memref<4x128xf32, #tpu.memory_space<vmem>>, vector<4x128xf32>
    %2 = vector.extract_strided_slice %1 {offsets = [0, 0], sizes = [1, 128], strides = [1, 1]} : vector<4x128xf32> to vector<1x128xf32>
    %3 = vector.extract_strided_slice %1 {offsets = [1, 0], sizes = [1, 128], strides = [1, 1]} : vector<4x128xf32> to vector<1x128xf32>
    %4 = vector.extract_strided_slice %1 {offsets = [2, 0], sizes = [1, 128], strides = [1, 1]} : vector<4x128xf32> to vector<1x128xf32>
    %5 = vector.extract_strided_slice %1 {offsets = [3, 0], sizes = [1, 128], strides = [1, 1]} : vector<4x128xf32> to vector<1x128xf32>
    %cst = arith.constant dense<0.000000e+00> : vector<8xf32>
    %6 = vector.multi_reduction <add>, %0, %cst [1] : vector<8x128xf32> to vector<8xf32>
    %7 = vector.shape_cast %6 : vector<8xf32> to vector<8x1xf32>
    %cst_3 = arith.constant 3.125000e-02 : f32
    %8 = vector.broadcast %cst_3 : f32 to vector<8x1xf32>
    %9 = arith.mulf %7, %8 : vector<8x1xf32>
    %10 = vector.broadcast %9 : vector<8x1xf32> to vector<8x128xf32>
    %11 = arith.subf %0, %10 : vector<8x128xf32>
    %12 = arith.mulf %11, %11 : vector<8x128xf32>
    %cst_4 = arith.constant dense<0.000000e+00> : vector<8xf32>
    %13 = vector.multi_reduction <add>, %12, %cst_4 [1] : vector<8x128xf32> to vector<8xf32>
    %14 = vector.shape_cast %13 : vector<8xf32> to vector<8x1xf32>
    %15 = arith.mulf %9, %9 : vector<8x1xf32>
    %cst_5 = arith.constant 9.600000e+01 : f32
    %16 = vector.broadcast %cst_5 : f32 to vector<8x1xf32>
    %17 = arith.mulf %16, %15 : vector<8x1xf32>
    %18 = arith.subf %14, %17 : vector<8x1xf32>
    %cst_6 = arith.constant 3.125000e-02 : f32
    %19 = vector.broadcast %cst_6 : f32 to vector<8x1xf32>
    %20 = arith.mulf %18, %19 : vector<8x1xf32>
    %cst_7 = arith.constant 0.000000e+00 : f32
    %21 = vector.broadcast %cst_7 : f32 to vector<8x1xf32>
    %22 = arith.maximumf %20, %21 : vector<8x1xf32>
    %cst_8 = arith.constant 9.99999974E-6 : f32
    %23 = vector.broadcast %cst_8 : f32 to vector<8x1xf32>
    %24 = arith.addf %22, %23 : vector<8x1xf32>
    %25 = math.rsqrt %24 : vector<8x1xf32>
    %26 = vector.broadcast %25 : vector<8x1xf32> to vector<8x128xf32>
    %27 = arith.mulf %11, %26 : vector<8x128xf32>
    %28 = vector.broadcast %2 : vector<1x128xf32> to vector<8x128xf32>
    %29 = arith.mulf %27, %28 : vector<8x128xf32>
    %30 = vector.broadcast %3 : vector<1x128xf32> to vector<8x128xf32>
    %31 = arith.addf %29, %30 : vector<8x128xf32>
    %c0_9 = arith.constant 0 : index
    %c0_10 = arith.constant 0 : index
    %32 = vector.load %arg3[%c0_9, %c0_10] : memref<128x128xf32, #tpu.memory_space<vmem>>, vector<128x128xf32>
    %cst_11 = arith.constant dense<0.000000e+00> : vector<8x128xf32>
    %33 = tpu.matmul %31, %32, %cst_11 {dimension_numbers = #tpu.dot_dimension_numbers<[1], [0], [0], [1], [0, 0, 1, 1], [], []>} : vector<8x128xf32>, vector<128x128xf32>, vector<8x128xf32> -> vector<8x128xf32>
    %34 = vector.broadcast %4 : vector<1x128xf32> to vector<8x128xf32>
    %35 = arith.addf %33, %34 : vector<8x128xf32>
    %cst_12 = arith.constant 5.000000e-01 : f32
    %36 = vector.broadcast %cst_12 : f32 to vector<8x128xf32>
    %37 = arith.mulf %36, %35 : vector<8x128xf32>
    %cst_13 = arith.constant 0.707106769 : f32
    %38 = vector.broadcast %cst_13 : f32 to vector<8x128xf32>
    %39 = arith.mulf %35, %38 : vector<8x128xf32>
    %40 = math.erf %39 : vector<8x128xf32>
    %cst_14 = arith.constant 1.000000e+00 : f32
    %41 = vector.broadcast %cst_14 : f32 to vector<8x128xf32>
    %42 = arith.addf %41, %40 : vector<8x128xf32>
    %43 = arith.mulf %37, %42 : vector<8x128xf32>
    %c0_15 = arith.constant 0 : index
    %c0_16 = arith.constant 0 : index
    %44 = vector.load %arg4[%c0_15, %c0_16] : memref<128x128xf32, #tpu.memory_space<vmem>>, vector<128x128xf32>
    %cst_17 = arith.constant dense<0.000000e+00> : vector<8x128xf32>
    %45 = tpu.matmul %43, %44, %cst_17 {dimension_numbers = #tpu.dot_dimension_numbers<[1], [0], [0], [1], [0, 0, 1, 1], [], []>} : vector<8x128xf32>, vector<128x128xf32>, vector<8x128xf32> -> vector<8x128xf32>
    %46 = vector.broadcast %5 : vector<1x128xf32> to vector<8x128xf32>
    %47 = arith.addf %45, %46 : vector<8x128xf32>
    %48 = arith.addf %31, %47 : vector<8x128xf32>
    %c0_18 = arith.constant 0 : index
    %c0_19 = arith.constant 0 : index
    %49 = vector.load %arg5[%c0_18, %c0_19] : memref<8x128xf32, #tpu.memory_space<vmem>>, vector<8x128xf32>
    tpu.vector_store %arg5[%c0_18, %c0_19], %48 {strides = array<i32>} : memref<8x128xf32, #tpu.memory_space<vmem>>, vector<8x128xf32>,
    return
  }
  func.func @transform_0(%arg0: i32) -> (i32, i32) {
    %c0_i32 = arith.constant 0 : i32
    %c0_i32_0 = arith.constant 0 : i32
    return %arg0, %c0_i32 : i32, i32
  }
  func.func @transform_1(%arg0: i32) -> (i32, i32) {
    %c0_i32 = arith.constant 0 : i32
    %c0_i32_0 = arith.constant 0 : i32
    %c0_i32_1 = arith.constant 0 : i32
    return %c0_i32, %c0_i32_0 : i32, i32
  }
  func.func @transform_2(%arg0: i32) -> (i32, i32) {
    %c0_i32 = arith.constant 0 : i32
    %c0_i32_0 = arith.constant 0 : i32
    %c0_i32_1 = arith.constant 0 : i32
    return %c0_i32, %c0_i32_0 : i32, i32
  }
  func.func @transform_3(%arg0: i32) -> (i32, i32) {
    %c0_i32 = arith.constant 0 : i32
    %c0_i32_0 = arith.constant 0 : i32
    %c0_i32_1 = arith.constant 0 : i32
    return %c0_i32, %c0_i32_0 : i32, i32
  }
  func.func @transform_4(%arg0: i32) -> (i32, i32) {
    %c0_i32 = arith.constant 0 : i32
    %c0_i32_0 = arith.constant 0 : i32
    return %arg0, %c0_i32 : i32, i32
  }
}

</mosaic_0001>

<bundles_post_ra>
// kernel: tpu_custom_call.1
= control target key start
LH: loop header
LB: loop body
LE: loop exit
PB: predicated region body
PF: predicated region fallthrough
CT: control target
= control target key end

     0   :  { %9 = vsyncpa [#allocation3], 0  ;;  %s1335_s0 = inlined_call_operand.hbm [shape: f32[16,128], index: 0, kind: input, shape index: {}]   ;;  %s1336_s1 = inlined_call_operand.hbm [shape: f32[4,128], index: 1, kind: input, shape index: {}]   ;;  %s1337_s2 = inlined_call_operand.hbm [shape: f32[128,128], index: 2, kind: input, shape index: {}]   ;;  %s1338_s3 = inlined_call_operand.hbm [shape: f32[128,128], index: 3, kind: input, shape index: {}]   ;;  %s1339_s4 = inlined_call_operand.hbm [shape: f32[16,128], index: 4, kind: output, shape index: {}]  }
   0x1   :  { %11 = vsyncpa [#allocation3 + $0x1], 0 }
   0x2   :  { %12 = vsyncpa [#allocation6], 0 }
   0x3   :  { %13 = vsyncpa [#allocation9], 0 }
   0x4   :  { %14 = vsyncpa [#allocation4], 0 }
   0x5   :  { %16 = vsyncpa [#allocation4 + $0x1], 0  ;;  %s1063_s15 = smov 0   ;;  %s1065_s16 = smov 0  }
   0x6   :  { %s1067_s17 = smov 0   ;;  %s1069_s18 = smov 0  }
   0x7 LB: > { %s1084_s19 = sadd.s32 4294967295, %s1026_s18   ;;  %s582_s20 = sadd.s32 4294967294, %s1026_s18   ;;  %s1026_s18 = sphi %s1069_s18, %s1362_s18   ;;  %s1022_s17 = sphi %s1067_s17, %s1361_s17   ;;  %s1018_s16 = sphi %s1065_s16, %s1360_s16   ;;  %s1014_s15 = sphi %s1063_s15, %s1359_s15  }
   0x8   : > { %p42_p0 = scmp.ne.s32.totalorder %s1018_s16, %s1014_s15  ;;  %p1340_p1 = scmp.eq.s32.totalorder %s1084_s19, 0 }
   0x9   : > { %p135_p3 = scmp.eq.s32.totalorder %s582_s20, 1  ;;  %p583_p5 = scmp.ge.s32.totalorder %s1026_s18, 1 }
   0xa   : > { %p1093_p4 = por %p1340_p1, %p42_p0  ;;  %p142_p7 = scmp.lt.s32.totalorder %s1026_s18, 3 }
   0xb   : > { %p1098_p6 = por %p135_p3, %p42_p0  ;;  %s1028_s24 = smov [#allocation5]  }
   0xc   : > { %s1343_s21 = scalar_select %p1093_p4, 1, 0 }
   0xd   : > { %s1344_s22 = scalar_select %p1098_p6, 1, 0 }
   0xe   : > { %p1103_p8 = pnand %p583_p5, %p142_p7  ;;  %s155_s25 = sshll.u32 %s1028_s24, 4  ;;  %s156_s25 = int_to_ptr.vmem [resolvable:$true] %s155_s25 }
   0xf   : > { %s1029_s26 = smov [#allocation7]   ;;  %s1030_s29 = smov [#allocation8]  }
  0x10   : > { %s1345_s23 = scalar_select %p1103_p8, 1, 0 }
  0x11   : > { %p768_p10 = pneg %p1103_p8  ;;  %s165_s27 = sshll.u32 %s1029_s26, 4  ;;  %s1116_s27 = int_to_ptr.vmem [resolvable:$true] %s165_s27 }
  0x12   : > { %s1118_s30 = sshll.u32 %s1030_s29, 4  ;;  %s838_s7 = scalar_lea.hbm %s1336_s1, 64  ;;  %s179_s30 = int_to_ptr.vmem [resolvable:$true] %s1118_s30 }
  0x13   : > { %p1112_p11 = pnand %p768_p10, %p1340_p1  ;;  %p839_p12 = scmp.ne.s32.totalorder %s1336_s1, %s838_s7 }
  0x14   : > { %p845_p5 = scmp.lt.u32.totalorder %s838_s7, %s1336_s1 }
  0x15   : > { %p1128_p13 = pneg %p1112_p11 }
  0x17   : > { %p841_p0 = pnand %p1128_p13, %p839_p12 }
  0x19   : > { %p842_p3 = pneg %p841_p0 }
  0x1b   : > { %p847_p7 = pnand %p845_p5, %p842_p3 }
  0x1d   : > { %850 = shalt.err (!%p847_p7)
}
  0x1e   : > { %s851_s13 = scalar_lea.vmem %s156_s25, 64  ;;  %p859_p2 = scmp.lt.s32.totalorder %s156_s25, %s156_s25 }
  0x1f   : > { %p852_p10 = scmp.ne.s32.totalorder %s156_s25, %s851_s13  ;;  %p860_p6 = scmp.lt.s32.totalorder %s851_s13, %s851_s13 }
  0x21   : > { %p854_p9 = pnand %p852_p10, %p1128_p13  ;;  %p861_p4 = por %p860_p6, %p859_p2 }
  0x23   : > { %p855_p1 = pneg %p854_p9 }
  0x25   : > { %p862_p8 = pnand %p861_p4, %p855_p1 }
  0x27   : > { %865 = shalt.err (!%p862_p8)
}
  0x28   : > { %771 = dma.hbm_to_vmem [thread:$0]  (!%p1112_p11), %s1336_s1, 64, %s156_s25, [#allocation6]  }
  0x29   : > { %s866_s29 = scalar_lea.hbm %s1337_s2, 2048 }
  0x2a   : > { %p867_p9 = scmp.ne.s32.totalorder %s1337_s2, %s866_s29  ;;  %p873_p1 = scmp.lt.u32.totalorder %s866_s29, %s1337_s2 }
  0x2c   : > { %p869_p12 = pnand %p867_p9, %p1128_p13 }
  0x2e   : > { %p870_p2 = pneg %p869_p12 }
  0x30   : > { %p875_p4 = pnand %p873_p1, %p870_p2 }
  0x32   : > { %878 = shalt.err (!%p875_p4)
}
  0x33   : > { %s879_s25 = scalar_lea.vmem %s1116_s27, 2048  ;;  %p887_p3 = scmp.lt.s32.totalorder %s1116_s27, %s1116_s27 }
  0x34   : > { %p880_p6 = scmp.ne.s32.totalorder %s1116_s27, %s879_s25  ;;  %p888_p5 = scmp.lt.s32.totalorder %s879_s25, %s879_s25 }
  0x36   : > { %p882_p8 = pnand %p880_p6, %p1128_p13  ;;  %p889_p7 = por %p888_p5, %p887_p3 }
  0x38   : > { %p883_p0 = pneg %p882_p8 }
  0x3a   : > { %p890_p10 = pnand %p889_p7, %p883_p0 }
  0x3c   : > { %893 = shalt.err (!%p890_p10)
}
  0x3d   : > { %s1031_s9 = smov 128   ;;  %s1032_s11 = smov 8  }
  0x3e   : > { %774 = dma.hbm_to_vmem [thread:$0]  (!%p1112_p11), %s1337_s2, 2048, %s1116_s27, [#allocation6], %s1031_s9, %s1031_s9, %s1032_s11  }
  0x3f   : > { %s894_s24 = scalar_lea.hbm %s1338_s3, 2048 }
  0x40   : > { %p895_p9 = scmp.ne.s32.totalorder %s1338_s3, %s894_s24  ;;  %p901_p1 = scmp.lt.u32.totalorder %s894_s24, %s1338_s3 }
  0x42   : > { %p897_p12 = pnand %p895_p9, %p1128_p13 }
  0x44   : > { %p898_p2 = pneg %p897_p12 }
  0x46   : > { %p903_p4 = pnand %p901_p1, %p898_p2 }
  0x48   : > { %906 = shalt.err (!%p903_p4)
}
  0x49   : > { %s907_s7 = scalar_lea.vmem %s179_s30, 2048  ;;  %p915_p3 = scmp.lt.s32.totalorder %s179_s30, %s179_s30 }
  0x4a   : > { %p908_p6 = scmp.ne.s32.totalorder %s179_s30, %s907_s7  ;;  %p916_p5 = scmp.lt.s32.totalorder %s907_s7, %s907_s7 }
  0x4c   : > { %p910_p8 = pnand %p908_p6, %p1128_p13  ;;  %p917_p7 = por %p916_p5, %p915_p3 }
  0x4e   : > { %p911_p0 = pneg %p910_p8 }
  0x50   : > { %p918_p10 = pnand %p917_p7, %p911_p0 }
  0x52   : > { %921 = shalt.err (!%p918_p10)
}
  0x53   : > { %777 = dma.hbm_to_vmem [thread:$0]  (!%p1112_p11), %s1338_s3, 2048, %s179_s30, [#allocation9], %s1031_s9, %s1031_s9, %s1032_s11  }
  0x54   : > { %s1187_s10 = sadd.s32 1, %s1026_s18   ;;  %s29_s28 = sadd.s32 1, %s1022_s17 }
  0x55   : > { %s26_s25 = ssub.s32 %s1026_s18, %s1187_s10  ;;  %p36_p9 = scmp.ne.s32.totalorder %s1022_s17, %s1018_s16 }
  0x56   : > { %p27_p13 = scmp.eq.s32.totalorder %s26_s25, 0  ;;  %p37_p12 = scmp.eq.s32.totalorder %s1026_s18, 0 }
  0x57   : > { %p789_p2 = scmp.lt.s32.totalorder %s1026_s18, 2  ;;  %p1348_p4 = scmp.eq.s32.totalorder %s1084_s19, 1 }
  0x58   : > { %s1197_s12 = scalar_select %p27_p13, %s1022_s17, %s29_s28  }
  0x59   : > { %p38_p1 = por %p37_p12, %p36_p9  ;;  %p1201_p6 = por %p1348_p4, %p36_p9 }
  0x5a   : > { %s192_s14 = sand.u32 1, %s1022_s17   ;;  %s589_s20 = sshll.u32 %s1026_s18, 7 }
  0x5b   : > { %s588_s30 = sshll.u32 %s192_s14, 3  ;;  %s1210_s24 = scalar_lea.hbm %s1335_s0, %s589_s20 }
  0x5c   : > { %s196_s26 = scalar_lea.vmem [#allocation2], %s588_s30  ;;  %p1212_p11 = pnand %p789_p2, %p38_p1 }
  0x5d   : > { %s203_s29 = sshll.u32 %s196_s26, 4  ;;  %s193_s6 = scalar_lea.sflag [#allocation3], %s192_s14  ;;  %s1216_s29 = int_to_ptr.vmem [resolvable:$true] %s203_s29 }
  0x5e   : > { %s922_s7 = scalar_lea.hbm %s1210_s24, 128  ;;  %p924_p0 = pneg %p1212_p11 }
  0x5f   : > { %p923_p8 = scmp.ne.s32.totalorder %s1210_s24, %s922_s7  ;;  %s927_s25 = scalar_lea.hbm %s1335_s0, 256 }
  0x60   : > { %p928_p7 = scmp.lt.u32.totalorder %s1210_s24, %s1335_s0  ;;  %p929_p10 = scmp.lt.u32.totalorder %s927_s25, %s922_s7 }
  0x61   : > { %p925_p3 = pnand %p924_p0, %p923_p8  ;;  %p931_p9 = scmp.lt.u32.totalorder %s922_s7, %s1210_s24 }
  0x62   : > { %p930_p13 = por %p929_p10, %p928_p7 }
  0x63   : > { %p926_p5 = pneg %p925_p3 }
  0x64   : > { %p932_p12 = por %p931_p9, %p930_p13 }
  0x66   : > { %p933_p2 = pnand %p932_p12, %p926_p5 }
  0x68   : > { %936 = shalt.err (!%p933_p2)
}
  0x69   : > { %s937_s14 = scalar_lea.vmem %s1216_s29, 128  ;;  %s1033_s30 = smov [#allocation2]  }
  0x6a   : > { %p938_p1 = scmp.ne.s32.totalorder %s1216_s29, %s937_s14  ;;  %s942_s9 = sshll.u32 %s1033_s30, 4  ;;  %s943_s9 = int_to_ptr.vmem [resolvable:$false] %s942_s9 }
  0x6b   : > { %s944_s11 = scalar_lea.vmem %s943_s9, 256  ;;  %p945_p3 = scmp.lt.s32.totalorder %s1216_s29, %s943_s9 }
  0x6c   : > { %p940_p4 = pnand %p938_p1, %p924_p0  ;;  %p946_p7 = scmp.lt.s32.totalorder %s944_s11, %s937_s14 }
  0x6e   : > { %p941_p8 = pneg %p940_p4  ;;  %p947_p10 = por %p946_p7, %p945_p3 }
  0x70   : > { %p948_p13 = pnand %p947_p10, %p941_p8 }
  0x72   : > { %951 = shalt.err (!%p948_p13)
}
  0x73   : > { %781 = dma.hbm_to_vmem [thread:$0]  (!%p1212_p11), %s1210_s24, 128, %s1216_s29, %s193_s6  }
  0x74   : > { %p1351_p5 = scmp.ne.s32.totalorder %s1345_s23, 0 }
  0x75   : > { %s1246_s26 = sand.u32 (!%p1351_p5), 1, %s1018_s16   ;;  %p1352_p0 = scmp.ne.s32.totalorder (!%p1351_p5), %s1343_s21, 0 }
  0x76   : > { %212 = sbr.rel (%p1351_p5) target bundleno = 910 (0x38e), region = 36  ;;  %s591_s7 = sshll.u32 (!%p1351_p5), %s1246_s26, 3 }
  0x77   : > { %s215_s27 = scalar_lea.sflag (!%p1351_p5), [#allocation3], %s1246_s26  ;;  %s218_s8 = scalar_lea.vmem (!%p1351_p5), [#allocation2], %s591_s7 }
  0x7d   : > { %997 = dma.done.wait (%p1352_p0), %s215_s27, 128  }
  0x7e   : > { %999 = vsyncadd (%p1352_p0), %s215_s27, 4294967168  ;;  %p1353_p11 = scmp.eq.s32.totalorder %s1084_s19, 0 }
  0x80   : > { %1001 = dma.done.wait (%p1353_p11), [#allocation6], 2112   ;;  %p1354_p9 = pmov %p1353_p11 }
  0x82   : > { %1003 = vsyncadd (%p1354_p9), [#allocation6], 4294965184  ;;  %p1355_p12 = pmov %p1354_p9 }
  0x83   : > { %p1356_p2 = pmov %p1354_p9 }
  0x84   : > { %1005 = dma.done.wait (%p1355_p12), [#allocation9], 2048  }
  0x85   : > { %1007 = vsyncadd (%p1356_p2), [#allocation9], 4294965248  ;;  %v255_v0 = vld [vmem:[%s218_s8] sm:$0xff]  ;;  %v282_v1 = vld [vmem:[#allocation7] sm:$0xff]  ;;  %v1034_v4 = vmov 0.0|0.0   ;;  %vm1035_vm0 = vmmov 0   ;;  %v272_v46 = vlaneseq }
  0x86   : > { %257 = vadd.xlane.f32.xlu0 %v255_v0  ;;  %v283_v2 = vld [vmem:[#allocation7 + $0x8] sm:$0xff]  ;;  %v284_v3 = vld [vmem:[#allocation7 + $0x10] sm:$0xff]  ;;  %704 = vmatprep.subr.bf16.mxu0 %v1034_v4  ;;  %v285_v6 = vld [vmem:[#allocation7 + $0x18] sm:$0xff]  ;;  %v1036_v23 = vmov 0.0   ;;  %s597_s21 = sshll.u32 %s1084_s19, 7  ;;  %s254_s23 = scalar_lea.vmem [#allocation10], %s591_s7 }
  0x87   : > { %v705_v5 = vpack.c.bf16 %v283_v2, %v282_v1  ;;  %728 = vmatprep.subr.bf16.mxu1 %v1034_v4  ;;  %v708_v7 = vpack.c.bf16 %v285_v6, %v284_v3  ;;  %v286_v12 = vld [vmem:[#allocation7 + $0x20] sm:$0xff]  ;;  %v287_v13 = vld [vmem:[#allocation7 + $0x28] sm:$0xff]  ;;  %v288_v15 = vld [vmem:[#allocation7 + $0x30] sm:$0xff]  ;;  %666 = vmatprep.mubr.msk.f32.mxu0 %vm1035_vm0, %v1036_v23  ;;  %v273_v48 = vshrl.u32 %v272_v46, 7  ;;  %s483_s24 = sshll.u32 %s254_s23, 4  ;;  %s1291_s6 = scalar_lea.hbm %s1339_s4, %s597_s21  ;;  %s1293_s24 = int_to_ptr.vmem [resolvable:$true] %s483_s24 }
  0x88   : > { %v711_v14 = vpack.c.bf16 %v287_v13, %v286_v12  ;;  %v289_v16 = vld [vmem:[#allocation7 + $0x38] sm:$0xff]  ;;  %v290_v18 = vld [vmem:[#allocation7 + $0x40] sm:$0xff]  ;;  %v291_v19 = vld [vmem:[#allocation7 + $0x48] sm:$0xff]  ;;  %701 = vmatprep.mubr.msk.f32.mxu1 %vm1035_vm0, %v1036_v23  ;;  %s470_s25 = scalar_lea.sflag [#allocation4], %s1246_s26  ;;  %s952_s28 = scalar_lea.vmem %s1293_s24, 128 }
  0x89   : > { %706 = vmatpush3.bf16.msra.mxu0 %v705_v5  ;;  %v714_v17 = vpack.c.bf16 %v289_v16, %v288_v15  ;;  %v717_v20 = vpack.c.bf16 %v291_v19, %v290_v18  ;;  %v292_v21 = vld [vmem:[#allocation7 + $0x50] sm:$0xff]  ;;  %v293_v22 = vld [vmem:[#allocation7 + $0x58] sm:$0xff]  ;;  %v294_v25 = vld [vmem:[#allocation7 + $0x60] sm:$0xff]  ;;  %v274_v49 = vsub.s32 0, %v273_v48  ;;  %v279_v51 = vsub.s32 1, %v273_v48  ;;  %p953_p1 = scmp.ne.s32.totalorder %s1293_s24, %s952_s28  ;;  %s1037_s19 = smov [#allocation10]  }
  0x8a   : > { %707 = vmatprep.subr.bf16.mxu0 %v1034_v4  ;;  %v720_v24 = vpack.c.bf16 %v293_v22, %v292_v21  ;;  %v295_v26 = vld [vmem:[#allocation7 + $0x68] sm:$0xff]  ;;  %v296_v28 = vld [vmem:[#allocation7 + $0x70] sm:$0xff]  ;;  %v297_v29 = vld [vmem:[#allocation7 + $0x78] sm:$0xff]  ;;  %s956_s20 = sshll.u32 %s1037_s19, 4  ;;  %s957_s20 = int_to_ptr.vmem [resolvable:$false] %s956_s20 }
  0x8b   : > { %v723_v27 = vpack.c.bf16 %v295_v26, %v294_v25  ;;  %v726_v30 = vpack.c.bf16 %v297_v29, %v296_v28  ;;  %v377_v31 = vld [vmem:[#allocation8] sm:$0xff]  ;;  %v378_v32 = vld [vmem:[#allocation8 + $0x8] sm:$0xff]  ;;  %v379_v33 = vld [vmem:[#allocation8 + $0x10] sm:$0xff]  ;;  %p954_p4 = pnand %p953_p1, %p1201_p6  ;;  %s958_s14 = scalar_lea.vmem %s957_s20, 256 }
  0x8c   : > { %v729_v34 = vpack.c.bf16 %v378_v32, %v377_v31  ;;  %v380_v35 = vld [vmem:[#allocation8 + $0x18] sm:$0xff]  ;;  %v381_v37 = vld [vmem:[#allocation8 + $0x20] sm:$0xff]  ;;  %v382_v38 = vld [vmem:[#allocation8 + $0x28] sm:$0xff]  ;;  %p959_p3 = scmp.lt.s32.totalorder %s1293_s24, %s957_s20  ;;  %p960_p7 = scmp.lt.s32.totalorder %s958_s14, %s952_s28 }
  0x8d   : > { %709 = vmatpush3.bf16.msra.mxu0 %v708_v7  ;;  %v732_v36 = vpack.c.bf16 %v380_v35, %v379_v33  ;;  %v735_v39 = vpack.c.bf16 %v382_v38, %v381_v37  ;;  %v256_v50 = vld [vmem:[#allocation5] sm:$0xf]  ;;  %v383_v58 = vld [vmem:[#allocation8 + $0x30] sm:$0xff]  ;;  %v385_v61 = vld [vmem:[#allocation8 + $0x40] sm:$0xff]  ;;  %p955_p8 = pneg %p954_p4 }
  0x8e   : > { %710 = vmatprep.subr.bf16.mxu0 %v1034_v4  ;;  %730 = vmatpush3.bf16.msra.mxu1 %v729_v34  ;;  %v275_v52 = vrot.slane %v256_v50, %v274_v49  ;;  %v280_v55 = vrot.slane %v256_v50, %v279_v51  ;;  %v384_v59 = vld [vmem:[#allocation8 + $0x38] sm:$0xff]  ;;  %v386_v62 = vld [vmem:[#allocation8 + $0x48] sm:$0xff]  ;;  %v389_v3 = vld [vmem:[#allocation8 + $0x60] sm:$0xff]  ;;  %p961_p10 = por %p960_p7, %p959_p3 }
  0x8f   : > { %731 = vmatprep.subr.bf16.mxu1 %v1034_v4  ;;  %v738_v60 = vpack.c.bf16 %v384_v59, %v383_v58  ;;  %v741_v63 = vpack.c.bf16 %v386_v62, %v385_v61  ;;  %v388_v1 = vld [vmem:[#allocation8 + $0x58] sm:$0xff]  ;;  %v390_v5 = vld [vmem:[#allocation8 + $0x68] sm:$0xff]  ;;  %v391_v7 = vld [vmem:[#allocation8 + $0x70] sm:$0xff] }
  0x90   : > { %v747_v6 = vpack.c.bf16 %v390_v5, %v389_v3  ;;  %p962_p13 = pnand %p961_p10, %p955_p8 }
  0x91   : > { %712 = vmatpush3.bf16.msra.mxu0 %v711_v14 }
  0x92   : > { %713 = vmatprep.subr.bf16.mxu0 %v1034_v4  ;;  %733 = vmatpush3.bf16.msra.mxu1 %v732_v36 }
  0x93   : > { %734 = vmatprep.subr.bf16.mxu1 %v1034_v4 }
  0x95   : > { %715 = vmatpush3.bf16.msra.mxu0 %v714_v17 }
  0x96   : > { %716 = vmatprep.subr.bf16.mxu0 %v1034_v4  ;;  %736 = vmatpush3.bf16.msra.mxu1 %v735_v39 }
  0x97   : > { %737 = vmatprep.subr.bf16.mxu1 %v1034_v4 }
  0x99   : > { %718 = vmatpush3.bf16.msra.mxu0 %v717_v20 }
  0x9a   : > { %719 = vmatprep.subr.bf16.mxu0 %v1034_v4  ;;  %739 = vmatpush3.bf16.msra.mxu1 %v738_v60 }
  0x9b   : > { %740 = vmatprep.subr.bf16.mxu1 %v1034_v4 }
  0x9d   : > { %721 = vmatpush3.bf16.msra.mxu0 %v720_v24 }
  0x9e   : > { %722 = vmatprep.subr.bf16.mxu0 %v1034_v4  ;;  %742 = vmatpush3.bf16.msra.mxu1 %v741_v63 }
  0x9f   : > { %743 = vmatprep.subr.bf16.mxu1 %v1034_v4 }
  0xa1   : > { %724 = vmatpush3.bf16.msra.mxu0 %v723_v27 }
  0xa2   : > { %725 = vmatprep.subr.bf16.mxu0 %v1034_v4 }
  0xa5   : > { %727 = vmatpush3.bf16.msra.mxu0 %v726_v30 }
 0x113   : > { %v258_v8 = vpop.xlane.xlu0 %257 }
 0x114   : > { %v259_v9 = vmul.f32 0.03125, %v258_v8  ;;  %v392_v8 = vld [vmem:[#allocation8 + $0x78] sm:$0xff] }
 0x116   : > { %v1268_v10 = vsub.f32 %v255_v0, %v259_v9  ;;  %v264_v40 = vmul.f32 %v259_v9, %v259_v9  ;;  %v387_v0 = vld [vmem:[#allocation8 + $0x50] sm:$0xff]  ;;  %v750_v9 = vpack.c.bf16 %v392_v8, %v391_v7 }
 0x117   : > { %v744_v2 = vpack.c.bf16 %v388_v1, %v387_v0 }
 0x118   : > { %v261_v11 = vmul.f32 %v1268_v10, %v1268_v10  ;;  %v265_v41 = vmul.f32 96.0, %v264_v40 }
 0x119   : > { %745 = vmatpush3.bf16.msra.mxu1 %v744_v2 }
 0x11a   : > { %262 = vadd.xlane.f32.xlu0 %v261_v11  ;;  %746 = vmatprep.subr.bf16.mxu1 %v1034_v4 }
 0x11d   : > { %748 = vmatpush3.bf16.msra.mxu1 %v747_v6 }
 0x11e   : > { %749 = vmatprep.subr.bf16.mxu1 %v1034_v4  ;;  %v395_v4 = vsub.s32 3, %v273_v48 }
 0x120   : > { %v396_v20 = vrot.slane %v256_v50, %v395_v4 }
 0x121   : > { %751 = vmatpush3.bf16.msra.mxu1 %v750_v9 }
 0x1a7   : > { %v263_v42 = vpop.xlane.xlu0 %262 }
 0x1a8   : > { %v266_v43 = vsub.f32 %v263_v42, %v265_v41 }
 0x1aa   : > { %v267_v44 = vmul.f32 0.03125, %v266_v43 }
 0x1ac   : > { %v268_v45 = vmax.f32 %v267_v44, 0.0 }
 0x1ae   : > { %v269_v47 = vadd.f32 1e-05, %v268_v45 }
 0x1b0   : > { %834 = vrsqrt.f32 %v269_v47 }
 0x1ba   : > { %v835_v53 = vpop.eup %834 }
 0x1bb   : > { %v271_v54 = vmul.f32 %v835_v53, %v1268_v10  ;;  %v300_v10 = vsub.s32 2, %v273_v48 }
 0x1bd   : > { %v276_v56 = vmul.f32 %v275_v52, %v271_v54  ;;  %v301_v11 = vrot.slane %v256_v50, %v300_v10 }
 0x1bf   : > { %v281_v57 = vadd.f32 %v280_v55, %v276_v56 }
 0x1c1   : > { %667 = vmatmul.mubr.f32.vlgmr.msra.gmra.mrb[0].mxu0 %v281_v57 }
 0x294   : > { %v368_v12 = vpop.f32.mrb[0].mxu0 }
 0x295   : > { %v369_v13 = vadd.f32 %v368_v12, %v301_v11  ;;  %v668_v14 = vpop.f32.mrb[1].mxu0 }
 0x297   : > { %v373_v15 = vmul.f32 0.70710677, %v369_v13  ;;  %v372_v17 = vmul.f32 0.5, %v369_v13 }
 0x299   : > { %836 = verf.f32 %v373_v15 }
 0x2a3   : > { %v837_v16 = vpop.eup %836 }
 0x2a4   : > { %v375_v18 = vadd.f32 1.0, %v837_v16 }
 0x2a6   : > { %v376_v19 = vmul.f32 %v375_v18, %v372_v17 }
 0x2a8   : > { %702 = vmatmul.mubr.f32.vlgmr.msra.gmra.mrb[0].mxu1 %v376_v19 }
 0x37b   : > { %v463_v21 = vpop.f32.mrb[0].mxu1 }
 0x37c   : > { %v464_v22 = vadd.f32 %v463_v21, %v396_v20  ;;  %v703_v23 = vpop.f32.mrb[1].mxu1 }
 0x37e   : > { %v467_v24 = vadd.f32 %v464_v22, %v281_v57 }
 0x380   : > { %468 = vst [vmem:[%s254_s23] sm:$0xff] %v467_v24 }
 0x381   : > { %965 = shalt.err (!%p962_p13)
}
 0x382   : > { %s966_s30 = scalar_lea.hbm %s1291_s6, 128  ;;  %s970_s26 = scalar_lea.hbm %s1339_s4, 256 }
 0x383   : > { %p967_p5 = scmp.ne.s32.totalorder %s1291_s6, %s966_s30  ;;  %p971_p9 = scmp.lt.u32.totalorder %s1291_s6, %s1339_s4 }
 0x384   : > { %p972_p12 = scmp.lt.u32.totalorder %s970_s26, %s966_s30  ;;  %p974_p1 = scmp.lt.u32.totalorder %s966_s30, %s1291_s6 }
 0x385   : > { %p968_p0 = pnand %p967_p5, %p1201_p6 }
 0x386   : > { %p973_p2 = por %p972_p12, %p971_p9 }
 0x387   : > { %p969_p11 = pneg %p968_p0 }
 0x388   : > { %p975_p4 = por %p974_p1, %p973_p2 }
 0x38a   : > { %p976_p8 = pnand %p975_p4, %p969_p11 }
 0x38c   : > { %979 = shalt.err (!%p976_p8)
}
 0x38d   : > { %766 = dma.vmem_to_hbm [thread:$0]  (%p1201_p6), %s1293_s24, 128, %s1291_s6, %s470_s25  }
 0x38e PF: > { %s495_s8 = sand.u32 1, %s1014_s15   ;;  %p1357_p3 = scmp.ne.s32.totalorder %s1344_s22, 0 }
 0x38f   : > { %p1358_p7 = scmp.ge.s32.totalorder %s1026_s18, 2  ;;  %s496_s21 = scalar_lea.sflag [#allocation4], %s495_s8 }
 0x391   : > { %p783_p10 = pnand %p1358_p7, %p1357_p3 }
 0x393   : > { %1009 = dma.done.wait (!%p783_p10), %s496_s21, 128  }
 0x394   : > { %1011 = vsyncadd (!%p783_p10), %s496_s21, 4294967168  ;;  %p19_p13 = scmp.ge.s32.totalorder %s1187_s10, 4   ;;  %s1359_s15 = smov %s1018_s16 }
 0x395   : > { %s1360_s16 = smov %s1022_s17  ;;  %s1361_s17 = smov %s1197_s12 }
 0x396   : > { %s1362_s18 = smov %s1187_s10  ;;  %21 = sbr.rel (!%p19_p13) target bundleno = 7 (0x7), region = 93 }
 0x39d   :  { %501 = vsyncpa [#allocation3], 1 }
 0x39e   :  { %503 = vsyncpa [#allocation3 + $0x1], 1 }
 0x39f   :  { %504 = vsyncpa [#allocation6], 1 }
 0x3a0   :  { %505 = vsyncpa [#allocation9], 1 }
 0x3a1   :  { %506 = vsyncpa [#allocation4], 1 }
 0x3a2   :  { %508 = vsyncpa [#allocation4 + $0x1], 1 }

// kernel: tpu_custom_call.1
= control target key start
LH: loop header
LB: loop body
LE: loop exit
PB: predicated region body
PF: predicated region fallthrough
CT: control target
= control target key end

     0   :  { %9 = vsyncpa [#allocation3], 0  ;;  %s1335_s0 = inlined_call_operand.hbm [shape: f32[16,128], index: 0, kind: input, shape index: {}]   ;;  %s1336_s1 = inlined_call_operand.hbm [shape: f32[4,128], index: 1, kind: input, shape index: {}]   ;;  %s1337_s2 = inlined_call_operand.hbm [shape: f32[128,128], index: 2, kind: input, shape index: {}]   ;;  %s1338_s3 = inlined_call_operand.hbm [shape: f32[128,128], index: 3, kind: input, shape index: {}]   ;;  %s1339_s4 = inlined_call_operand.hbm [shape: f32[16,128], index: 4, kind: output, shape index: {}]  }
   0x1   :  { %11 = vsyncpa [#allocation3 + $0x1], 0 }
   0x2   :  { %12 = vsyncpa [#allocation6], 0 }
   0x3   :  { %13 = vsyncpa [#allocation9], 0 }
   0x4   :  { %14 = vsyncpa [#allocation4], 0 }
   0x5   :  { %16 = vsyncpa [#allocation4 + $0x1], 0  ;;  %s1063_s15 = smov 0   ;;  %s1065_s16 = smov 0  }
   0x6   :  { %s1067_s17 = smov 0   ;;  %s1069_s18 = smov 0  }
   0x7 LB: > { %s1084_s19 = sadd.s32 4294967295, %s1026_s18   ;;  %s582_s20 = sadd.s32 4294967294, %s1026_s18   ;;  %s1026_s18 = sphi %s1069_s18, %s1362_s18   ;;  %s1022_s17 = sphi %s1067_s17, %s1361_s17   ;;  %s1018_s16 = sphi %s1065_s16, %s1360_s16   ;;  %s1014_s15 = sphi %s1063_s15, %s1359_s15  }
   0x8   : > { %p42_p0 = scmp.ne.s32.totalorder %s1018_s16, %s1014_s15  ;;  %p1340_p1 = scmp.eq.s32.totalorder %s1084_s19, 0 }
   0x9   : > { %p135_p3 = scmp.eq.s32.totalorder %s582_s20, 1  ;;  %p583_p5 = scmp.ge.s32.totalorder %s1026_s18, 1 }
   0xa   : > { %p1093_p4 = por %p1340_p1, %p42_p0  ;;  %p142_p7 = scmp.lt.s32.totalorder %s1026_s18, 3 }
   0xb   : > { %p1098_p6 = por %p135_p3, %p42_p0  ;;  %s1028_s24 = smov [#allocation5]  }
   0xc   : > { %s1343_s21 = scalar_select %p1093_p4, 1, 0 }
   0xd   : > { %s1344_s22 = scalar_select %p1098_p6, 1, 0 }
   0xe   : > { %p1103_p8 = pnand %p583_p5, %p142_p7  ;;  %s155_s25 = sshll.u32 %s1028_s24, 4  ;;  %s156_s25 = int_to_ptr.vmem [resolvable:$true] %s155_s25 }
   0xf   : > { %s1029_s26 = smov [#allocation7]   ;;  %s1030_s29 = smov [#allocation8]  }
  0x10   : > { %s1345_s23 = scalar_select %p1103_p8, 1, 0 }
  0x11   : > { %p768_p10 = pneg %p1103_p8  ;;  %s165_s27 = sshll.u32 %s1029_s26, 4  ;;  %s1116_s27 = int_to_ptr.vmem [resolvable:$true] %s165_s27 }
  0x12   : > { %s1118_s30 = sshll.u32 %s1030_s29, 4  ;;  %s838_s7 = scalar_lea.hbm %s1336_s1, 64  ;;  %s179_s30 = int_to_ptr.vmem [resolvable:$true] %s1118_s30 }
  0x13   : > { %p1112_p11 = pnand %p768_p10, %p1340_p1  ;;  %p839_p12 = scmp.ne.s32.totalorder %s1336_s1, %s838_s7 }
  0x14   : > { %p845_p5 = scmp.lt.u32.totalorder %s838_s7, %s1336_s1 }
  0x15   : > { %p1128_p13 = pneg %p1112_p11 }
  0x17   : > { %p841_p0 = pnand %p1128_p13, %p839_p12 }
  0x19   : > { %p842_p3 = pneg %p841_p0 }
  0x1b   : > { %p847_p7 = pnand %p845_p5, %p842_p3 }
  0x1d   : > { %850 = shalt.err (!%p847_p7)
}
  0x1e   : > { %s851_s13 = scalar_lea.vmem %s156_s25, 64  ;;  %p859_p2 = scmp.lt.s32.totalorder %s156_s25, %s156_s25 }
  0x1f   : > { %p852_p10 = scmp.ne.s32.totalorder %s156_s25, %s851_s13  ;;  %p860_p6 = scmp.lt.s32.totalorder %s851_s13, %s851_s13 }
  0x21   : > { %p854_p9 = pnand %p852_p10, %p1128_p13  ;;  %p861_p4 = por %p860_p6, %p859_p2 }
  0x23   : > { %p855_p1 = pneg %p854_p9 }
  0x25   : > { %p862_p8 = pnand %p861_p4, %p855_p1 }
  0x27   : > { %865 = shalt.err (!%p862_p8)
}
  0x28   : > { %771 = dma.hbm_to_vmem [thread:$0]  (!%p1112_p11), %s1336_s1, 64, %s156_s25, [#allocation6]  }
  0x29   : > { %s866_s29 = scalar_lea.hbm %s1337_s2, 2048 }
  0x2a   : > { %p867_p9 = scmp.ne.s32.totalorder %s1337_s2, %s866_s29  ;;  %p873_p1 = scmp.lt.u32.totalorder %s866_s29, %s1337_s2 }
  0x2c   : > { %p869_p12 = pnand %p867_p9, %p1128_p13 }
  0x2e   : > { %p870_p2 = pneg %p869_p12 }
  0x30   : > { %p875_p4 = pnand %p873_p1, %p870_p2 }
  0x32   : > { %878 = shalt.err (!%p875_p4)
}
  0x33   : > { %s879_s25 = scalar_lea.vmem %s1116_s27, 2048  ;;  %p887_p3 = scmp.lt.s32.totalorder %s1116_s27, %s1116_s27 }
  0x34   : > { %p880_p6 = scmp.ne.s32.totalorder %s1116_s27, %s879_s25  ;;  %p888_p5 = scmp.lt.s32.totalorder %s879_s25, %s879_s25 }
  0x36   : > { %p882_p8 = pnand %p880_p6, %p1128_p13  ;;  %p889_p7 = por %p888_p5, %p887_p3 }
  0x38   : > { %p883_p0 = pneg %p882_p8 }
  0x3a   : > { %p890_p10 = pnand %p889_p7, %p883_p0 }
  0x3c   : > { %893 = shalt.err (!%p890_p10)
}
  0x3d   : > { %s1031_s9 = smov 128   ;;  %s1032_s11 = smov 8  }
  0x3e   : > { %774 = dma.hbm_to_vmem [thread:$0]  (!%p1112_p11), %s1337_s2, 2048, %s1116_s27, [#allocation6], %s1031_s9, %s1031_s9, %s1032_s11  }
  0x3f   : > { %s894_s24 = scalar_lea.hbm %s1338_s3, 2048 }
  0x40   : > { %p895_p9 = scmp.ne.s32.totalorder %s1338_s3, %s894_s24  ;;  %p901_p1 = scmp.lt.u32.totalorder %s894_s24, %s1338_s3 }
  0x42   : > { %p897_p12 = pnand %p895_p9, %p1128_p13 }
  0x44   : > { %p898_p2 = pneg %p897_p12 }
  0x46   : > { %p903_p4 = pnand %p901_p1, %p898_p2 }
  0x48   : > { %906 = shalt.err (!%p903_p4)
}
  0x49   : > { %s907_s7 = scalar_lea.vmem %s179_s30, 2048  ;;  %p915_p3 = scmp.lt.s32.totalorder %s179_s30, %s179_s30 }
  0x4a   : > { %p908_p6 = scmp.ne.s32.totalorder %s179_s30, %s907_s7  ;;  %p916_p5 = scmp.lt.s32.totalorder %s907_s7, %s907_s7 }
  0x4c   : > { %p910_p8 = pnand %p908_p6, %p1128_p13  ;;  %p917_p7 = por %p916_p5, %p915_p3 }
  0x4e   : > { %p911_p0 = pneg %p910_p8 }
  0x50   : > { %p918_p10 = pnand %p917_p7, %p911_p0 }
  0x52   : > { %921 = shalt.err (!%p918_p10)
}
  0x53   : > { %777 = dma.hbm_to_vmem [thread:$0]  (!%p1112_p11), %s1338_s3, 2048, %s179_s30, [#allocation9], %s1031_s9, %s1031_s9, %s1032_s11  }
  0x54   : > { %s1187_s10 = sadd.s32 1, %s1026_s18   ;;  %s29_s28 = sadd.s32 1, %s1022_s17 }
  0x55   : > { %s26_s25 = ssub.s32 %s1026_s18, %s1187_s10  ;;  %p36_p9 = scmp.ne.s32.totalorder %s1022_s17, %s1018_s16 }
  0x56   : > { %p27_p13 = scmp.eq.s32.totalorder %s26_s25, 0  ;;  %p37_p12 = scmp.eq.s32.totalorder %s1026_s18, 0 }
  0x57   : > { %p789_p2 = scmp.lt.s32.totalorder %s1026_s18, 2  ;;  %p1348_p4 = scmp.eq.s32.totalorder %s1084_s19, 1 }
  0x58   : > { %s1197_s12 = scalar_select %p27_p13, %s1022_s17, %s29_s28  }
  0x59   : > { %p38_p1 = por %p37_p12, %p36_p9  ;;  %p1201_p6 = por %p1348_p4, %p36_p9 }
  0x5a   : > { %s192_s14 = sand.u32 1, %s1022_s17   ;;  %s589_s20 = sshll.u32 %s1026_s18, 7 }
  0x5b   : > { %s588_s30 = sshll.u32 %s192_s14, 3  ;;  %s1210_s24 = scalar_lea.hbm %s1335_s0, %s589_s20 }
  0x5c   : > { %s196_s26 = scalar_lea.vmem [#allocation2], %s588_s30  ;;  %p1212_p11 = pnand %p789_p2, %p38_p1 }
  0x5d   : > { %s203_s29 = sshll.u32 %s196_s26, 4  ;;  %s193_s6 = scalar_lea.sflag [#allocation3], %s192_s14  ;;  %s1216_s29 = int_to_ptr.vmem [resolvable:$true] %s203_s29 }
  0x5e   : > { %s922_s7 = scalar_lea.hbm %s1210_s24, 128  ;;  %p924_p0 = pneg %p1212_p11 }
  0x5f   : > { %p923_p8 = scmp.ne.s32.totalorder %s1210_s24, %s922_s7  ;;  %s927_s25 = scalar_lea.hbm %s1335_s0, 256 }
  0x60   : > { %p928_p7 = scmp.lt.u32.totalorder %s1210_s24, %s1335_s0  ;;  %p929_p10 = scmp.lt.u32.totalorder %s927_s25, %s922_s7 }
  0x61   : > { %p925_p3 = pnand %p924_p0, %p923_p8  ;;  %p931_p9 = scmp.lt.u32.totalorder %s922_s7, %s1210_s24 }
  0x62   : > { %p930_p13 = por %p929_p10, %p928_p7 }
  0x63   : > { %p926_p5 = pneg %p925_p3 }
  0x64   : > { %p932_p12 = por %p931_p9, %p930_p13 }
  0x66   : > { %p933_p2 = pnand %p932_p12, %p926_p5 }
  0x68   : > { %936 = shalt.err (!%p933_p2)
}
  0x69   : > { %s937_s14 = scalar_lea.vmem %s1216_s29, 128  ;;  %s1033_s30 = smov [#allocation2]  }
  0x6a   : > { %p938_p1 = scmp.ne.s32.totalorder %s1216_s29, %s937_s14  ;;  %s942_s9 = sshll.u32 %s1033_s30, 4  ;;  %s943_s9 = int_to_ptr.vmem [resolvable:$false] %s942_s9 }
  0x6b   : > { %s944_s11 = scalar_lea.vmem %s943_s9, 256  ;;  %p945_p3 = scmp.lt.s32.totalorder %s1216_s29, %s943_s9 }
  0x6c   : > { %p940_p4 = pnand %p938_p1, %p924_p0  ;;  %p946_p7 = scmp.lt.s32.totalorder %s944_s11, %s937_s14 }
  0x6e   : > { %p941_p8 = pneg %p940_p4  ;;  %p947_p10 = por %p946_p7, %p945_p3 }
  0x70   : > { %p948_p13 = pnand %p947_p10, %p941_p8 }
  0x72   : > { %951 = shalt.err (!%p948_p13)
}
  0x73   : > { %781 = dma.hbm_to_vmem [thread:$0]  (!%p1212_p11), %s1210_s24, 128, %s1216_s29, %s193_s6  }
  0x74   : > { %p1351_p5 = scmp.ne.s32.totalorder %s1345_s23, 0 }
  0x75   : > { %s1246_s26 = sand.u32 (!%p1351_p5), 1, %s1018_s16   ;;  %p1352_p0 = scmp.ne.s32.totalorder (!%p1351_p5), %s1343_s21, 0 }
  0x76   : > { %212 = sbr.rel (%p1351_p5) target bundleno = 910 (0x38e), region = 36  ;;  %s591_s7 = sshll.u32 (!%p1351_p5), %s1246_s26, 3 }
  0x77   : > { %s215_s27 = scalar_lea.sflag (!%p1351_p5), [#allocation3], %s1246_s26  ;;  %s218_s8 = scalar_lea.vmem (!%p1351_p5), [#allocation2], %s591_s7 }
  0x7d   : > { %997 = dma.done.wait (%p1352_p0), %s215_s27, 128  }
  0x7e   : > { %999 = vsyncadd (%p1352_p0), %s215_s27, 4294967168  ;;  %p1353_p11 = scmp.eq.s32.totalorder %s1084_s19, 0 }
  0x80   : > { %1001 = dma.done.wait (%p1353_p11), [#allocation6], 2112   ;;  %p1354_p9 = pmov %p1353_p11 }
  0x82   : > { %1003 = vsyncadd (%p1354_p9), [#allocation6], 4294965184  ;;  %p1355_p12 = pmov %p1354_p9 }
  0x83   : > { %p1356_p2 = pmov %p1354_p9 }
  0x84   : > { %1005 = dma.done.wait (%p1355_p12), [#allocation9], 2048  }
  0x85   : > { %1007 = vsyncadd (%p1356_p2), [#allocation9], 4294965248  ;;  %v255_v0 = vld [vmem:[%s218_s8] sm:$0xff]  ;;  %v282_v1 = vld [vmem:[#allocation7] sm:$0xff]  ;;  %v1034_v4 = vmov 0.0|0.0   ;;  %vm1035_vm0 = vmmov 0   ;;  %v272_v46 = vlaneseq }
  0x86   : > { %257 = vadd.xlane.f32.xlu0 %v255_v0  ;;  %v283_v2 = vld [vmem:[#allocation7 + $0x8] sm:$0xff]  ;;  %v284_v3 = vld [vmem:[#allocation7 + $0x10] sm:$0xff]  ;;  %704 = vmatprep.subr.bf16.mxu0 %v1034_v4  ;;  %v285_v6 = vld [vmem:[#allocation7 + $0x18] sm:$0xff]  ;;  %v1036_v23 = vmov 0.0   ;;  %s597_s21 = sshll.u32 %s1084_s19, 7  ;;  %s254_s23 = scalar_lea.vmem [#allocation10], %s591_s7 }
  0x87   : > { %v705_v5 = vpack.c.bf16 %v283_v2, %v282_v1  ;;  %728 = vmatprep.subr.bf16.mxu1 %v1034_v4  ;;  %v708_v7 = vpack.c.bf16 %v285_v6, %v284_v3  ;;  %v286_v12 = vld [vmem:[#allocation7 + $0x20] sm:$0xff]  ;;  %v287_v13 = vld [vmem:[#allocation7 + $0x28] sm:$0xff]  ;;  %v288_v15 = vld [vmem:[#allocation7 + $0x30] sm:$0xff]  ;;  %666 = vmatprep.mubr.msk.f32.mxu0 %vm1035_vm0, %v1036_v23  ;;  %v273_v48 = vshrl.u32 %v272_v46, 7  ;;  %s483_s24 = sshll.u32 %s254_s23, 4  ;;  %s1291_s6 = scalar_lea.hbm %s1339_s4, %s597_s21  ;;  %s1293_s24 = int_to_ptr.vmem [resolvable:$true] %s483_s24 }
  0x88   : > { %v711_v14 = vpack.c.bf16 %v287_v13, %v286_v12  ;;  %v289_v16 = vld [vmem:[#allocation7 + $0x38] sm:$0xff]  ;;  %v290_v18 = vld [vmem:[#allocation7 + $0x40] sm:$0xff]  ;;  %v291_v19 = vld [vmem:[#allocation7 + $0x48] sm:$0xff]  ;;  %701 = vmatprep.mubr.msk.f32.mxu1 %vm1035_vm0, %v1036_v23  ;;  %s470_s25 = scalar_lea.sflag [#allocation4], %s1246_s26  ;;  %s952_s28 = scalar_lea.vmem %s1293_s24, 128 }
  0x89   : > { %706 = vmatpush3.bf16.msra.mxu0 %v705_v5  ;;  %v714_v17 = vpack.c.bf16 %v289_v16, %v288_v15  ;;  %v717_v20 = vpack.c.bf16 %v291_v19, %v290_v18  ;;  %v292_v21 = vld [vmem:[#allocation7 + $0x50] sm:$0xff]  ;;  %v293_v22 = vld [vmem:[#allocation7 + $0x58] sm:$0xff]  ;;  %v294_v25 = vld [vmem:[#allocation7 + $0x60] sm:$0xff]  ;;  %v274_v49 = vsub.s32 0, %v273_v48  ;;  %v279_v51 = vsub.s32 1, %v273_v48  ;;  %p953_p1 = scmp.ne.s32.totalorder %s1293_s24, %s952_s28  ;;  %s1037_s19 = smov [#allocation10]  }
  0x8a   : > { %707 = vmatprep.subr.bf16.mxu0 %v1034_v4  ;;  %v720_v24 = vpack.c.bf16 %v293_v22, %v292_v21  ;;  %v295_v26 = vld [vmem:[#allocation7 + $0x68] sm:$0xff]  ;;  %v296_v28 = vld [vmem:[#allocation7 + $0x70] sm:$0xff]  ;;  %v297_v29 = vld [vmem:[#allocation7 + $0x78] sm:$0xff]  ;;  %s956_s20 = sshll.u32 %s1037_s19, 4  ;;  %s957_s20 = int_to_ptr.vmem [resolvable:$false] %s956_s20 }
  0x8b   : > { %v723_v27 = vpack.c.bf16 %v295_v26, %v294_v25  ;;  %v726_v30 = vpack.c.bf16 %v297_v29, %v296_v28  ;;  %v377_v31 = vld [vmem:[#allocation8] sm:$0xff]  ;;  %v378_v32 = vld [vmem:[#allocation8 + $0x8] sm:$0xff]  ;;  %v379_v33 = vld [vmem:[#allocation8 + $0x10] sm:$0xff]  ;;  %p954_p4 = pnand %p953_p1, %p1201_p6  ;;  %s958_s14 = scalar_lea.vmem %s957_s20, 256 }
  0x8c   : > { %v729_v34 = vpack.c.bf16 %v378_v32, %v377_v31  ;;  %v380_v35 = vld [vmem:[#allocation8 + $0x18] sm:$0xff]  ;;  %v381_v37 = vld [vmem:[#allocation8 + $0x20] sm:$0xff]  ;;  %v382_v38 = vld [vmem:[#allocation8 + $0x28] sm:$0xff]  ;;  %p959_p3 = scmp.lt.s32.totalorder %s1293_s24, %s957_s20  ;;  %p960_p7 = scmp.lt.s32.totalorder %s958_s14, %s952_s28 }
  0x8d   : > { %709 = vmatpush3.bf16.msra.mxu0 %v708_v7  ;;  %v732_v36 = vpack.c.bf16 %v380_v35, %v379_v33  ;;  %v735_v39 = vpack.c.bf16 %v382_v38, %v381_v37  ;;  %v256_v50 = vld [vmem:[#allocation5] sm:$0xf]  ;;  %v383_v58 = vld [vmem:[#allocation8 + $0x30] sm:$0xff]  ;;  %v385_v61 = vld [vmem:[#allocation8 + $0x40] sm:$0xff]  ;;  %p955_p8 = pneg %p954_p4 }
  0x8e   : > { %710 = vmatprep.subr.bf16.mxu0 %v1034_v4  ;;  %730 = vmatpush3.bf16.msra.mxu1 %v729_v34  ;;  %v275_v52 = vrot.slane %v256_v50, %v274_v49  ;;  %v280_v55 = vrot.slane %v256_v50, %v279_v51  ;;  %v384_v59 = vld [vmem:[#allocation8 + $0x38] sm:$0xff]  ;;  %v386_v62 = vld [vmem:[#allocation8 + $0x48] sm:$0xff]  ;;  %v389_v3 = vld [vmem:[#allocation8 + $0x60] sm:$0xff]  ;;  %p961_p10 = por %p960_p7, %p959_p3 }
  0x8f   : > { %731 = vmatprep.subr.bf16.mxu1 %v1034_v4  ;;  %v738_v60 = vpack.c.bf16 %v384_v59, %v383_v58  ;;  %v741_v63 = vpack.c.bf16 %v386_v62, %v385_v61  ;;  %v388_v1 = vld [vmem:[#allocation8 + $0x58] sm:$0xff]  ;;  %v390_v5 = vld [vmem:[#allocation8 + $0x68] sm:$0xff]  ;;  %v391_v7 = vld [vmem:[#allocation8 + $0x70] sm:$0xff] }
  0x90   : > { %v747_v6 = vpack.c.bf16 %v390_v5, %v389_v3  ;;  %p962_p13 = pnand %p961_p10, %p955_p8 }
  0x91   : > { %712 = vmatpush3.bf16.msra.mxu0 %v711_v14 }
  0x92   : > { %713 = vmatprep.subr.bf16.mxu0 %v1034_v4  ;;  %733 = vmatpush3.bf16.msra.mxu1 %v732_v36 }
  0x93   : > { %734 = vmatprep.subr.bf16.mxu1 %v1034_v4 }
  0x95   : > { %715 = vmatpush3.bf16.msra.mxu0 %v714_v17 }
  0x96   : > { %716 = vmatprep.subr.bf16.mxu0 %v1034_v4  ;;  %736 = vmatpush3.bf16.msra.mxu1 %v735_v39 }
  0x97   : > { %737 = vmatprep.subr.bf16.mxu1 %v1034_v4 }
  0x99   : > { %718 = vmatpush3.bf16.msra.mxu0 %v717_v20 }
  0x9a   : > { %719 = vmatprep.subr.bf16.mxu0 %v1034_v4  ;;  %739 = vmatpush3.bf16.msra.mxu1 %v738_v60 }
  0x9b   : > { %740 = vmatprep.subr.bf16.mxu1 %v1034_v4 }
  0x9d   : > { %721 = vmatpush3.bf16.msra.mxu0 %v720_v24 }
  0x9e   : > { %722 = vmatprep.subr.bf16.mxu0 %v1034_v4  ;;  %742 = vmatpush3.bf16.msra.mxu1 %v741_v63 }
  0x9f   : > { %743 = vmatprep.subr.bf16.mxu1 %v1034_v4 }
  0xa1   : > { %724 = vmatpush3.bf16.msra.mxu0 %v723_v27 }
  0xa2   : > { %725 = vmatprep.subr.bf16.mxu0 %v1034_v4 }
  0xa5   : > { %727 = vmatpush3.bf16.msra.mxu0 %v726_v30 }
 0x113   : > { %v258_v8 = vpop.xlane.xlu0 %257 }
 0x114   : > { %v259_v9 = vmul.f32 0.03125, %v258_v8  ;;  %v392_v8 = vld [vmem:[#allocation8 + $0x78] sm:$0xff] }
 0x116   : > { %v1268_v10 = vsub.f32 %v255_v0, %v259_v9  ;;  %v264_v40 = vmul.f32 %v259_v9, %v259_v9  ;;  %v387_v0 = vld [vmem:[#allocation8 + $0x50] sm:$0xff]  ;;  %v750_v9 = vpack.c.bf16 %v392_v8, %v391_v7 }
 0x117   : > { %v744_v2 = vpack.c.bf16 %v388_v1, %v387_v0 }
 0x118   : > { %v261_v11 = vmul.f32 %v1268_v10, %v1268_v10  ;;  %v265_v41 = vmul.f32 96.0, %v264_v40 }
 0x119   : > { %745 = vmatpush3.bf16.msra.mxu1 %v744_v2 }
 0x11a   : > { %262 = vadd.xlane.f32.xlu0 %v261_v11  ;;  %746 = vmatprep.subr.bf16.mxu1 %v1034_v4 }
 0x11d   : > { %748 = vmatpush3.bf16.msra.mxu1 %v747_v6 }
 0x11e   : > { %749 = vmatprep.subr.bf16.mxu1 %v1034_v4  ;;  %v395_v4 = vsub.s32 3, %v273_v48 }
 0x120   : > { %v396_v20 = vrot.slane %v256_v50, %v395_v4 }
 0x121   : > { %751 = vmatpush3.bf16.msra.mxu1 %v750_v9 }
 0x1a7   : > { %v263_v42 = vpop.xlane.xlu0 %262 }
 0x1a8   : > { %v266_v43 = vsub.f32 %v263_v42, %v265_v41 }
 0x1aa   : > { %v267_v44 = vmul.f32 0.03125, %v266_v43 }
 0x1ac   : > { %v268_v45 = vmax.f32 %v267_v44, 0.0 }
 0x1ae   : > { %v269_v47 = vadd.f32 1e-05, %v268_v45 }
 0x1b0   : > { %834 = vrsqrt.f32 %v269_v47 }
 0x1ba   : > { %v835_v53 = vpop.eup %834 }
 0x1bb   : > { %v271_v54 = vmul.f32 %v835_v53, %v1268_v10  ;;  %v300_v10 = vsub.s32 2, %v273_v48 }
 0x1bd   : > { %v276_v56 = vmul.f32 %v275_v52, %v271_v54  ;;  %v301_v11 = vrot.slane %v256_v50, %v300_v10 }
 0x1bf   : > { %v281_v57 = vadd.f32 %v280_v55, %v276_v56 }
 0x1c1   : > { %667 = vmatmul.mubr.f32.vlgmr.msra.gmra.mrb[0].mxu0 %v281_v57 }
 0x294   : > { %v368_v12 = vpop.f32.mrb[0].mxu0 }
 0x295   : > { %v369_v13 = vadd.f32 %v368_v12, %v301_v11  ;;  %v668_v14 = vpop.f32.mrb[1].mxu0 }
 0x297   : > { %v373_v15 = vmul.f32 0.70710677, %v369_v13  ;;  %v372_v17 = vmul.f32 0.5, %v369_v13 }
 0x299   : > { %836 = verf.f32 %v373_v15 }
 0x2a3   : > { %v837_v16 = vpop.eup %836 }
 0x2a4   : > { %v375_v18 = vadd.f32 1.0, %v837_v16 }
 0x2a6   : > { %v376_v19 = vmul.f32 %v375_v18, %v372_v17 }
 0x2a8   : > { %702 = vmatmul.mubr.f32.vlgmr.msra.gmra.mrb[0].mxu1 %v376_v19 }
 0x37b   : > { %v463_v21 = vpop.f32.mrb[0].mxu1 }
 0x37c   : > { %v464_v22 = vadd.f32 %v463_v21, %v396_v20  ;;  %v703_v23 = vpop.f32.mrb[1].mxu1 }
 0x37e   : > { %v467_v24 = vadd.f32 %v464_v22, %v281_v57 }
 0x380   : > { %468 = vst [vmem:[%s254_s23] sm:$0xff] %v467_v24 }
 0x381   : > { %965 = shalt.err (!%p962_p13)
}
 0x382   : > { %s966_s30 = scalar_lea.hbm %s1291_s6, 128  ;;  %s970_s26 = scalar_lea.hbm %s1339_s4, 256 }
 0x383   : > { %p967_p5 = scmp.ne.s32.totalorder %s1291_s6, %s966_s30  ;;  %p971_p9 = scmp.lt.u32.totalorder %s1291_s6, %s1339_s4 }
 0x384   : > { %p972_p12 = scmp.lt.u32.totalorder %s970_s26, %s966_s30  ;;  %p974_p1 = scmp.lt.u32.totalorder %s966_s30, %s1291_s6 }
 0x385   : > { %p968_p0 = pnand %p967_p5, %p1201_p6 }
 0x386   : > { %p973_p2 = por %p972_p12, %p971_p9 }
 0x387   : > { %p969_p11 = pneg %p968_p0 }
 0x388   : > { %p975_p4 = por %p974_p1, %p973_p2 }
 0x38a   : > { %p976_p8 = pnand %p975_p4, %p969_p11 }
 0x38c   : > { %979 = shalt.err (!%p976_p8)
}
 0x38d   : > { %766 = dma.vmem_to_hbm [thread:$0]  (%p1201_p6), %s1293_s24, 128, %s1291_s6, %s470_s25  }
 0x38e PF: > { %s495_s8 = sand.u32 1, %s1014_s15   ;;  %p1357_p3 = scmp.ne.s32.totalorder %s1344_s22, 0 }
 0x38f   : > { %p1358_p7 = scmp.ge.s32.totalorder %s1026_s18, 2  ;;  %s496_s21 = scalar_lea.sflag [#allocation4], %s495_s8 }
 0x391   : > { %p783_p10 = pnand %p1358_p7, %p1357_p3 }
 0x393   : > { %1009 = dma.done.wait (!%p783_p10), %s496_s21, 128  }
 0x394   : > { %1011 = vsyncadd (!%p783_p10), %s496_s21, 4294967168  ;;  %p19_p13 = scmp.ge.s32.totalorder %s1187_s10, 4   ;;  %s1359_s15 = smov %s1018_s16 }
 0x395   : > { %s1360_s16 = smov %s1022_s17  ;;  %s1361_s17 = smov %s1197_s12 }
 0x396   : > { %s1362_s18 = smov %s1187_s10  ;;  %21 = sbr.rel (!%p19_p13) target bundleno = 7 (0x7), region = 93 }
 0x39d   :  { %501 = vsyncpa [#allocation3], 1 }
 0x39e   :  { %503 = vsyncpa [#allocation3 + $0x1], 1 }
 0x39f   :  { %504 = vsyncpa [#allocation6], 1 }
 0x3a0   :  { %505 = vsyncpa [#allocation9], 1 }
 0x3a1   :  { %506 = vsyncpa [#allocation4], 1 }
 0x3a2   :  { %508 = vsyncpa [#allocation4 + $0x1], 1 }

</bundles_post_ra>
